<compile_context>
chip_gen: v7x
topology: tpu7x:2x2x1
jax: 0.10.0
libtpu: 0.0.40
codegen_flags: <defaults>
</compile_context>

<pallas_src>
import functools

import jax
import jax.numpy as jnp
from jax.experimental import pallas as pl
from jax.experimental.pallas import tpu as pltpu


def _round_up(x: int, m: int) -> int:
    return ((x + m - 1) // m) * m


def _chip_defaults():
    """Returns (lane-pack group G, product_in_f32) for the attached TPU.

    G matches the native MXU dimension (128 -> G=4, 256 -> G=8 for F=H=32) so one
    block-diagonal matmul fills the array.  Chips <= v5 have no bf16 VPU, so the
    elementwise x_i*x_j product stays in f32 there.
    """
    kind = ""
    try:
        kind = jax.devices()[0].device_kind.lower()
    except Exception:
        pass
    old = any(t in kind for t in ("v2", "v3", "v4", "v5"))
    return (4 if old else 8), old


# ----------------------------------------------------------------------------
# Kernel
# ----------------------------------------------------------------------------
def _linkpredictor_kernel(xi_ref, xj_ref,
                          w0_ref, b0_ref,
                          w1_ref, b1_ref,
                          w2_ref, b2_ref,
                          o_ref, *, product_in_f32):
    xi = xi_ref[...]
    xj = xj_ref[...]
    if product_in_f32:
        # <= v5: no bf16 VPU, do the product in f32 then feed the MXU in bf16.
        x = (xi.astype(jnp.float32) * xj.astype(jnp.float32)).astype(jnp.bfloat16)
    else:
        # v6e / v7x: bf16 VPU -> halve VALU ops / vreg pressure for this stage.
        x = (xi * xj).astype(jnp.bfloat16)

    # Layer 0: block-diagonal Linear -> ReLU.  bf16 MXU inputs, f32 accumulation.
    h = jnp.dot(x, w0_ref[...], preferred_element_type=jnp.float32)
    h = jnp.maximum(h + b0_ref[...], 0.0)
    # TODO(synk): dropout is identity in eval mode; training-mode dropout would need
    # pltpu.prng_seed + pltpu.stateful_bernoulli here.

    # Layer 1: block-diagonal Linear -> ReLU.
    h = jnp.dot(h.astype(jnp.bfloat16), w1_ref[...], preferred_element_type=jnp.float32)
    h = jnp.maximum(h + b1_ref[...], 0.0)

    # Final layer (out_channels == 1): (H*G, G) block-diagonal reduce on the MXU.
    # Produces one logit per packed sub-row -> a G-lane-wide output store.
    z = jnp.dot(h.astype(jnp.bfloat16), w2_ref[...], preferred_element_type=jnp.float32)
    z = z + b2_ref[...]

    # sigmoid(z) = 1 / (1 + exp(-z)): exp and reciprocal both on the EUP slot.
    o_ref[...] = pl.reciprocal(1.0 + jnp.exp(-z), approx=True)


# ----------------------------------------------------------------------------
# One-time parameter preparation (hoisted out of the per-call wrapper).
# ----------------------------------------------------------------------------
def prepare_params(params, *, group=8):
    """params: list of 3 (W, b) in PyTorch convention (out_f, in_f), (out_f,).

    Builds block-diagonal (in*G, out*G) bf16 weights (G copies of W on the diagonal,
    exact zeros elsewhere), G-tiled f32 biases, and the (hidden*G, G) block-diagonal
    reduce weight for the out_channels==1 final layer.  Call once at model load.
    """
    assert len(params) == 3, "this kernel is specialized for num_layers=3"
    (w0, b0), (w1, b1), (w2, b2) = params
    assert w2.shape[0] == 1, "final layer must have out_channels == 1"
    G = int(group)
    eye = jnp.eye(G, dtype=jnp.float32)

    w0t = jnp.asarray(w0, jnp.float32).T          # (in,  hidden)
    w1t = jnp.asarray(w1, jnp.float32).T          # (hid, hidden)
    w2c = jnp.asarray(w2, jnp.float32).T          # (hid, 1)

    return dict(
        group=G,
        in_channels=int(w0.shape[1]),
        hidden=int(w0.shape[0]),
        w0=jnp.kron(eye, w0t).astype(jnp.bfloat16),            # (in*G,  hid*G)
        b0=jnp.tile(jnp.asarray(b0, jnp.float32).reshape(1, -1), (1, G)),
        w1=jnp.kron(eye, w1t).astype(jnp.bfloat16),            # (hid*G, hid*G)
        b1=jnp.tile(jnp.asarray(b1, jnp.float32).reshape(1, -1), (1, G)),
        w2=jnp.kron(eye, w2c).astype(jnp.bfloat16),            # (hid*G, G)
        b2=jnp.asarray(b2, jnp.float32).reshape(1, 1),
    )


# ----------------------------------------------------------------------------
# Wrapper
# ----------------------------------------------------------------------------
def link_predictor(x_i, x_j, prepared, *, tile_rows=8192, product_in_f32=False):
    """prepared: output of prepare_params().  x_i/x_j: (B, in_channels), ideally
    bf16 from upstream.  tile_rows counts ORIGINAL rows per grid step."""
    G = prepared["group"]
    F = prepared["in_channels"]
    H = prepared["hidden"]
    w0, b0 = prepared["w0"], prepared["b0"]
    w1, b1 = prepared["w1"], prepared["b1"]
    w2, b2 = prepared["w2"], prepared["b2"]

    B = x_i.shape[0]
    assert x_i.shape == (B, F) and x_j.shape == (B, F)
    assert w0.shape == (F * G, H * G) and w1.shape == (H * G, H * G)
    assert w2.shape == (H * G, G)

    # Lane-packing: G original (., F) rows -> one (., F*G) row via a free
    # contiguous row-major reshape.  Pad only when B % G != 0 (at most G-1 rows);
    # there is no full-array jnp.pad on the hot path — the grid uses pl.cdiv and
    # Pallas masks the trailing partial block.
    Bg = _round_up(B, G)
    if Bg != B:
        x_i = jnp.pad(x_i, ((0, Bg - B), (0, 0)))
        x_j = jnp.pad(x_j, ((0, Bg - B), (0, 0)))
    rows = Bg // G
    x_i = x_i.reshape(rows, F * G)
    x_j = x_j.reshape(rows, F * G)

    # Packed-row tile: large (multiple of 128) to amortize the ~0.35 us/step grid
    # overhead, clamped so the grid has >= 2 steps whenever possible (both v7x
    # TensorCores get work).  Always a multiple of 16 so bf16 blocks match the
    # native (16, 128) tile.
    tm_target = _round_up(max(tile_rows // G, 128), 128)
    tm = min(tm_target, max(16, _round_up(pl.cdiv(rows, 2), 16)))
    grid = (pl.cdiv(rows, tm),)

    in_specs = [
        pl.BlockSpec((tm, F * G), lambda i: (i, 0)),   # x_i: per-step tile
        pl.BlockSpec((tm, F * G), lambda i: (i, 0)),   # x_j: per-step tile
        pl.BlockSpec(w0.shape, lambda i: (0, 0)),      # weights/biases: VMEM-resident
        pl.BlockSpec(b0.shape, lambda i: (0, 0)),
        pl.BlockSpec(w1.shape, lambda i: (0, 0)),
        pl.BlockSpec(b1.shape, lambda i: (0, 0)),
        pl.BlockSpec(w2.shape, lambda i: (0, 0)),
        pl.BlockSpec(b2.shape, lambda i: (0, 0)),
    ]
    out_specs = pl.BlockSpec((tm, G), lambda i: (i, 0))
    out_shape = jax.ShapeDtypeStruct((rows, G), jnp.float32)

    # Advisory cost estimate for XLA's scheduler (counts the block-diagonal matmuls
    # actually executed on the MXU).
    flops = rows * (F * G
                    + 2 * (F * G) * (H * G)
                    + 2 * (H * G) * (H * G)
                    + 2 * (H * G) * G)
    bytes_accessed = (2 * rows * F * G * x_i.dtype.itemsize
                      + w0.size * w0.dtype.itemsize
                      + w1.size * w1.dtype.itemsize
                      + w2.size * w2.dtype.itemsize
                      + (b0.size + b1.size + b2.size) * 4
                      + rows * G * 4)
    cost = pl.CostEstimate(flops=int(flops),
                           transcendentals=int(2 * rows * G),
                           bytes_accessed=int(bytes_accessed))

    kernel = functools.partial(_linkpredictor_kernel, product_in_f32=product_in_f32)
    out = pl.pallas_call(
        kernel,
        out_shape=out_shape,
        grid=grid,
        in_specs=in_specs,
        out_specs=out_specs,
        compiler_params=pltpu.CompilerParams(
            dimension_semantics=("parallel",)),   # shards across v7x's 2 TCs
        cost_estimate=cost,
    )(x_i, x_j, w0, b0, w1, b1, w2, b2)

    # Free contiguous reshape back to one probability per edge; drop the (< G)
    # packing-pad rows.
    return out.reshape(Bg, 1)[:B]


# ----------------------------------------------------------------------------
# References
# ----------------------------------------------------------------------------
def _reference_mixed(x_i, x_j, params, *, product_in_f32):
    """Mirrors the kernel's mixed precision (bf16 matmul inputs, f32 acc); the
    block-diagonal packing itself is mathematically exact (off-diagonal zeros)."""
    (w0, b0), (w1, b1), (w2, b2) = params
    if product_in_f32:
        x = (x_i.astype(jnp.float32) * x_j.astype(jnp.float32)).astype(jnp.bfloat16)
    else:
        x = (x_i * x_j).astype(jnp.bfloat16)
    w0b = jnp.asarray(w0, jnp.float32).T.astype(jnp.bfloat16)
    w1b = jnp.asarray(w1, jnp.float32).T.astype(jnp.bfloat16)
    w2b = jnp.asarray(w2, jnp.float32).T.astype(jnp.bfloat16)
    h = jnp.maximum(jnp.dot(x, w0b, preferred_element_type=jnp.float32)
                    + b0.reshape(1, -1), 0.0)
    h = jnp.maximum(jnp.dot(h.astype(jnp.bfloat16), w1b, preferred_element_type=jnp.float32)
                    + b1.reshape(1, -1), 0.0)
    z = jnp.dot(h.astype(jnp.bfloat16), w2b, preferred_element_type=jnp.float32) \
        + b2.reshape(1, -1)
    return jax.nn.sigmoid(z)


def _reference_f32(x_i, x_j, params):
    """Full-f32 PyTorch-equivalent forward."""
    x = x_i * x_j
    for (w, b) in params[:-1]:
        x = jnp.maximum(x @ w.T + b, 0.0)
    w, b = params[-1]
    return jax.nn.sigmoid(x @ w.T + b)


# ----------------------------------------------------------------------------
if __name__ == "__main__":
    # Decoder config: in_channels=32, hidden_channels=32, out_channels=1, num_layers=3
    in_channels, hidden_channels, out_channels = 32, 32, 1
    batch = 200   # not a tile multiple -> exercises the masked partial last block

    group, product_in_f32 = _chip_defaults()

    key = jax.random.PRNGKey(0)
    k_xi, k_xj, k0, k1, k2, k3, k4, k5 = jax.random.split(key, 8)

    # Upstream node embeddings arrive in bf16 (halves HBM input traffic).
    x_i = jax.random.normal(k_xi, (batch, in_channels), jnp.float32).astype(jnp.bfloat16)
    x_j = jax.random.normal(k_xj, (batch, in_channels), jnp.float32).astype(jnp.bfloat16)

    # Deterministic parameter init (PyTorch Linear weight shape: (out, in)).
    def init_linear(kw, kb, fan_in, fan_out):
        bound = 1.0 / (fan_in ** 0.5)
        w = jax.random.uniform(kw, (fan_out, fan_in), jnp.float32, -bound, bound)
        b = jax.random.uniform(kb, (fan_out,), jnp.float32, -bound, bound)
        return w, b

    params = [
        init_linear(k0, k1, in_channels, hidden_channels),
        init_linear(k2, k3, hidden_channels, hidden_channels),
        init_linear(k4, k5, hidden_channels, out_channels),
    ]
    prepared = prepare_params(params, group=group)   # one-time: kron / tile / bf16 cast

    out = link_predictor(x_i, x_j, prepared, product_in_f32=product_in_f32)
    out = jax.block_until_ready(out)
    assert out.shape == (batch, out_channels)

    # Tight check vs a reference with the same mixed precision (only the approximate
    # EUP reciprocal in the sigmoid differs).
    ref_mixed = _reference_mixed(x_i, x_j, params, product_in_f32=product_in_f32)
    assert jnp.allclose(out, ref_mixed, atol=5e-3), "mismatch vs mixed-precision reference"

    # Loose check vs the full-f32 PyTorch-equivalent forward (bf16 matmul inputs
    # introduce ~0.5% relative error pre-sigmoid).
    ref_f32 = _reference_f32(x_i.astype(jnp.float32), x_j.astype(jnp.float32), params)
    assert jnp.allclose(out, ref_f32, atol=3e-2), "mismatch vs f32 reference"

    print("KERNEL_OK")
</pallas_src>

<mosaic_0001>
module attributes {stable_mosaic.version = 11 : i64} {
  func.func @_linkpredictor_kernel(%arg0: i32, %arg1: memref<16x256xbf16, #tpu.memory_space<vmem>>, %arg2: memref<16x256xbf16, #tpu.memory_space<vmem>>, %arg3: memref<256x256xbf16, #tpu.memory_space<vmem>>, %arg4: memref<1x256xf32, #tpu.memory_space<vmem>>, %arg5: memref<256x256xbf16, #tpu.memory_space<vmem>>, %arg6: memref<1x256xf32, #tpu.memory_space<vmem>>, %arg7: memref<256x8xbf16, #tpu.memory_space<vmem>>, %arg8: memref<1x1xf32, #tpu.memory_space<vmem>>, %arg9: memref<16x8xf32, #tpu.memory_space<vmem>>) attributes {dimension_semantics = [#tpu.dimension_semantics<parallel>], iteration_bounds = array<i64: 2>, scalar_prefetch = 0 : i64, scratch_operands = 0 : i64, tpu.core_type = #tpu.core_type<tc>, window_params = [{transform_indices = @transform_0, window_bounds = array<i64: 16, 256>}, {transform_indices = @transform_1, window_bounds = array<i64: 16, 256>}, {pipeline_mode = #tpu.pipeline_mode<synchronous>, transform_indices = @transform_2, window_bounds = array<i64: 256, 256>}, {pipeline_mode = #tpu.pipeline_mode<synchronous>, transform_indices = @transform_3, window_bounds = array<i64: 1, 256>}, {pipeline_mode = #tpu.pipeline_mode<synchronous>, transform_indices = @transform_4, window_bounds = array<i64: 256, 256>}, {pipeline_mode = #tpu.pipeline_mode<synchronous>, transform_indices = @transform_5, window_bounds = array<i64: 1, 256>}, {pipeline_mode = #tpu.pipeline_mode<synchronous>, transform_indices = @transform_6, window_bounds = array<i64: 256, 8>}, {pipeline_mode = #tpu.pipeline_mode<synchronous>, transform_indices = @transform_7, window_bounds = array<i64: 1, 1>}, {transform_indices = @transform_8, window_bounds = array<i64: 16, 8>}]} {
    %c0 = arith.constant 0 : index
    %c0_0 = arith.constant 0 : index
    %0 = vector.load %arg1[%c0, %c0_0] : memref<16x256xbf16, #tpu.memory_space<vmem>>, vector<16x256xbf16>
    %c0_1 = arith.constant 0 : index
    %c0_2 = arith.constant 0 : index
    %1 = vector.load %arg2[%c0_1, %c0_2] : memref<16x256xbf16, #tpu.memory_space<vmem>>, vector<16x256xbf16>
    %2 = arith.mulf %0, %1 : vector<16x256xbf16>
    %c0_3 = arith.constant 0 : index
    %c0_4 = arith.constant 0 : index
    %3 = vector.load %arg3[%c0_3, %c0_4] : memref<256x256xbf16, #tpu.memory_space<vmem>>, vector<256x256xbf16>
    %cst = arith.constant dense<0.000000e+00> : vector<16x256xf32>
    %4 = tpu.matmul %2, %3, %cst {dimension_numbers = #tpu.dot_dimension_numbers<[1], [0], [0], [1], [0, 0, 1, 1], [], []>} : vector<16x256xbf16>, vector<256x256xbf16>, vector<16x256xf32> -> vector<16x256xf32>
    %c0_5 = arith.constant 0 : index
    %c0_6 = arith.constant 0 : index
    %5 = vector.load %arg4[%c0_5, %c0_6] : memref<1x256xf32, #tpu.memory_space<vmem>>, vector<1x256xf32>
    %6 = vector.broadcast %5 : vector<1x256xf32> to vector<16x256xf32>
    %7 = arith.addf %4, %6 : vector<16x256xf32>
    %cst_7 = arith.constant 0.000000e+00 : f32
    %8 = vector.broadcast %cst_7 : f32 to vector<16x256xf32>
    %9 = arith.maximumf %7, %8 : vector<16x256xf32>
    %10 = arith.truncf %9 : vector<16x256xf32> to vector<16x256xbf16>
    %c0_8 = arith.constant 0 : index
    %c0_9 = arith.constant 0 : index
    %11 = vector.load %arg5[%c0_8, %c0_9] : memref<256x256xbf16, #tpu.memory_space<vmem>>, vector<256x256xbf16>
    %cst_10 = arith.constant dense<0.000000e+00> : vector<16x256xf32>
    %12 = tpu.matmul %10, %11, %cst_10 {dimension_numbers = #tpu.dot_dimension_numbers<[1], [0], [0], [1], [0, 0, 1, 1], [], []>} : vector<16x256xbf16>, vector<256x256xbf16>, vector<16x256xf32> -> vector<16x256xf32>
    %c0_11 = arith.constant 0 : index
    %c0_12 = arith.constant 0 : index
    %13 = vector.load %arg6[%c0_11, %c0_12] : memref<1x256xf32, #tpu.memory_space<vmem>>, vector<1x256xf32>
    %14 = vector.broadcast %13 : vector<1x256xf32> to vector<16x256xf32>
    %15 = arith.addf %12, %14 : vector<16x256xf32>
    %cst_13 = arith.constant 0.000000e+00 : f32
    %16 = vector.broadcast %cst_13 : f32 to vector<16x256xf32>
    %17 = arith.maximumf %15, %16 : vector<16x256xf32>
    %18 = arith.truncf %17 : vector<16x256xf32> to vector<16x256xbf16>
    %c0_14 = arith.constant 0 : index
    %c0_15 = arith.constant 0 : index
    %19 = vector.load %arg7[%c0_14, %c0_15] : memref<256x8xbf16, #tpu.memory_space<vmem>>, vector<256x8xbf16>
    %cst_16 = arith.constant dense<0.000000e+00> : vector<16x8xf32>
    %20 = tpu.matmul %18, %19, %cst_16 {dimension_numbers = #tpu.dot_dimension_numbers<[1], [0], [0], [1], [0, 0, 1, 1], [], []>} : vector<16x256xbf16>, vector<256x8xbf16>, vector<16x8xf32> -> vector<16x8xf32>
    %c0_17 = arith.constant 0 : index
    %c0_18 = arith.constant 0 : index
    %21 = vector.load %arg8[%c0_17, %c0_18] : memref<1x1xf32, #tpu.memory_space<vmem>>, vector<1x1xf32>
    %22 = vector.broadcast %21 : vector<1x1xf32> to vector<16x8xf32>
    %23 = arith.addf %20, %22 : vector<16x8xf32>
    %cst_19 = arith.constant 0.000000e+00 : f32
    %24 = vector.broadcast %cst_19 : f32 to vector<16x8xf32>
    %25 = arith.subf %24, %23 : vector<16x8xf32>
    %26 = math.exp %25 : vector<16x8xf32>
    %cst_20 = arith.constant 1.000000e+00 : f32
    %27 = vector.broadcast %cst_20 : f32 to vector<16x8xf32>
    %28 = arith.addf %27, %26 : vector<16x8xf32>
    %29 = tpu.reciprocal %28 {approx = true} : vector<16x8xf32> -> vector<16x8xf32>
    %c0_21 = arith.constant 0 : index
    %c0_22 = arith.constant 0 : index
    %30 = vector.load %arg9[%c0_21, %c0_22] : memref<16x8xf32, #tpu.memory_space<vmem>>, vector<16x8xf32>
    tpu.vector_store %arg9[%c0_21, %c0_22], %29 {strides = array<i32>} : memref<16x8xf32, #tpu.memory_space<vmem>>, vector<16x8xf32>,
    return
  }
  func.func @transform_0(%arg0: i32) -> (i32, i32) {
    %c0_i32 = arith.constant 0 : i32
    %c0_i32_0 = arith.constant 0 : i32
    return %arg0, %c0_i32 : i32, i32
  }
  func.func @transform_1(%arg0: i32) -> (i32, i32) {
    %c0_i32 = arith.constant 0 : i32
    %c0_i32_0 = arith.constant 0 : i32
    return %arg0, %c0_i32 : i32, i32
  }
  func.func @transform_2(%arg0: i32) -> (i32, i32) {
    %c0_i32 = arith.constant 0 : i32
    %c0_i32_0 = arith.constant 0 : i32
    %c0_i32_1 = arith.constant 0 : i32
    return %c0_i32, %c0_i32_0 : i32, i32
  }
  func.func @transform_3(%arg0: i32) -> (i32, i32) {
    %c0_i32 = arith.constant 0 : i32
    %c0_i32_0 = arith.constant 0 : i32
    %c0_i32_1 = arith.constant 0 : i32
    return %c0_i32, %c0_i32_0 : i32, i32
  }
  func.func @transform_4(%arg0: i32) -> (i32, i32) {
    %c0_i32 = arith.constant 0 : i32
    %c0_i32_0 = arith.constant 0 : i32
    %c0_i32_1 = arith.constant 0 : i32
    return %c0_i32, %c0_i32_0 : i32, i32
  }
  func.func @transform_5(%arg0: i32) -> (i32, i32) {
    %c0_i32 = arith.constant 0 : i32
    %c0_i32_0 = arith.constant 0 : i32
    %c0_i32_1 = arith.constant 0 : i32
    return %c0_i32, %c0_i32_0 : i32, i32
  }
  func.func @transform_6(%arg0: i32) -> (i32, i32) {
    %c0_i32 = arith.constant 0 : i32
    %c0_i32_0 = arith.constant 0 : i32
    %c0_i32_1 = arith.constant 0 : i32
    return %c0_i32, %c0_i32_0 : i32, i32
  }
  func.func @transform_7(%arg0: i32) -> (i32, i32) {
    %c0_i32 = arith.constant 0 : i32
    %c0_i32_0 = arith.constant 0 : i32
    %c0_i32_1 = arith.constant 0 : i32
    return %c0_i32, %c0_i32_0 : i32, i32
  }
  func.func @transform_8(%arg0: i32) -> (i32, i32) {
    %c0_i32 = arith.constant 0 : i32
    %c0_i32_0 = arith.constant 0 : i32
    return %arg0, %c0_i32 : i32, i32
  }
}

</mosaic_0001>

<bundles_post_ra>
// kernel: tpu_custom_call.1
= control target key start
LH: loop header
LB: loop body
LE: loop exit
PB: predicated region body
PF: predicated region fallthrough
CT: control target
= control target key end

     0   :  { %s1744_s0 = inlined_call_operand.vmem [shape: bf16[25,256], index: 0, kind: input, shape index: {}]   ;;  %s1745_s1 = inlined_call_operand.vmem [shape: bf16[25,256], index: 1, kind: input, shape index: {}]   ;;  %s1746_s2 = inlined_call_operand.hbm [shape: bf16[256,256], index: 2, kind: input, shape index: {}]   ;;  %s1747_s3 = inlined_call_operand.vmem [shape: f32[1,256], index: 3, kind: input, shape index: {}]   ;;  %s1748_s4 = inlined_call_operand.hbm [shape: bf16[256,256], index: 4, kind: input, shape index: {}]   ;;  %s1749_s5 = inlined_call_operand.vmem [shape: f32[1,256], index: 5, kind: input, shape index: {}]   ;;  %s1750_s6 = inlined_call_operand.vmem [shape: bf16[256,8], index: 6, kind: input, shape index: {}]   ;;  %s1751_s7 = inlined_call_operand.<no memory space> [shape: f32[1,1], index: 7, kind: input, shape index: {}]   ;;  %s1752_s8 = inlined_call_operand.vmem [shape: f32[25,8], index: 8, kind: output, shape index: {}]  }
   0x1   :  { %v13_v0 = vstv %s1751_s7 }
   0x2   :  { %14 = vst [vmem:[#allocation2] sm:$0x1] %v13_v0 }
   0x3   :  { %15 = vsyncpa [#allocation4], 0 }
   0x4   :  { %16 = vsyncpa [#allocation6], 0  ;;  %s1578_s29 = smov 0  }
   0x5 LB: > { %s1174_s30 = sadd.s32 4294967295, %s1523_s29   ;;  %p1176_p0 = scmp.ge.s32.totalorder %s1523_s29, 1  ;;  %s1523_s29 = sphi %s1578_s29, %s22_s29  }
   0x6   : > { %p231_p1 = scmp.lt.s32.totalorder %s1523_s29, 3  ;;  %s1525_s9 = smov [#allocation3]  }
   0x7   : > { %s243_s10 = sshll.u32 %s1525_s9, 4  ;;  %p1592_p3 = scmp.eq.s32.totalorder %s1174_s30, 0  ;;  %s244_s10 = int_to_ptr.vmem [resolvable:$true] %s243_s10 }
   0x8   : > { %p1586_p2 = pnand %p1176_p0, %p231_p1  ;;  %s1526_s12 = smov [#allocation5]  }
   0x9   : > { %s1757_s11 = scalar_select %p1592_p3, 1, 0 }
   0xa   : > { %s1756_s7 = scalar_select %p1586_p2, 1, 0 }
   0xb   : > { %p1308_p4 = pneg %p1586_p2  ;;  %s259_s13 = sshll.u32 %s1526_s12, 4  ;;  %s1604_s13 = int_to_ptr.vmem [resolvable:$true] %s259_s13 }
   0xc   : > { %s1453_s17 = scalar_lea.hbm %s1746_s2, 4096 }
   0xd   : > { %p1600_p5 = pnand %p1592_p3, %p1308_p4  ;;  %p1454_p6 = scmp.ne.s32.totalorder %s1746_s2, %s1453_s17 }
   0xe   : > { %p1460_p10 = scmp.lt.u32.totalorder %s1453_s17, %s1746_s2 }
   0xf   : > { %p1455_p7 = pneg %p1600_p5 }
  0x11   : > { %p1456_p8 = pnand %p1455_p7, %p1454_p6 }
  0x13   : > { %p1457_p9 = pneg %p1456_p8 }
  0x15   : > { %p1462_p11 = pnand %p1460_p10, %p1457_p9 }
  0x17   : > { %1465 = shalt.err (!%p1462_p11)
}
  0x18   : > { %s1466_s22 = scalar_lea.vmem %s244_s10, 4096  ;;  %p1474_p1 = scmp.lt.s32.totalorder %s244_s10, %s244_s10 }
  0x19   : > { %p1467_p12 = scmp.ne.s32.totalorder %s244_s10, %s1466_s22  ;;  %p1475_p4 = scmp.lt.s32.totalorder %s1466_s22, %s1466_s22 }
  0x1b   : > { %p1469_p13 = pnand %p1467_p12, %p1455_p7  ;;  %p1476_p3 = por %p1475_p4, %p1474_p1 }
  0x1d   : > { %p1470_p0 = pneg %p1469_p13 }
  0x1f   : > { %p1477_p2 = pnand %p1476_p3, %p1470_p0 }
  0x21   : > { %1480 = shalt.err (!%p1477_p2)
}
  0x22   : > { %s1527_s23 = smov 128   ;;  %s1528_s24 = smov 8  }
  0x23   : > { %1311 = dma.hbm_to_vmem [thread:$0]  (!%p1600_p5), %s1746_s2, 4096, %s244_s10, [#allocation4], %s1527_s23, %s1527_s23, %s1528_s24  }
  0x24   : > { %s1481_s9 = scalar_lea.hbm %s1748_s4, 4096 }
  0x25   : > { %p1482_p6 = scmp.ne.s32.totalorder %s1748_s4, %s1481_s9  ;;  %p1488_p8 = scmp.lt.u32.totalorder %s1481_s9, %s1748_s4 }
  0x27   : > { %p1484_p2 = pnand %p1482_p6, %p1455_p7 }
  0x29   : > { %p1485_p3 = pneg %p1484_p2 }
  0x2b   : > { %p1490_p9 = pnand %p1488_p8, %p1485_p3 }
  0x2d   : > { %1493 = shalt.err (!%p1490_p9)
}
  0x2e   : > { %s1494_s10 = scalar_lea.vmem %s1604_s13, 4096  ;;  %p1502_p13 = scmp.lt.s32.totalorder %s1604_s13, %s1604_s13 }
  0x2f   : > { %p1495_p10 = scmp.ne.s32.totalorder %s1604_s13, %s1494_s10  ;;  %p1503_p0 = scmp.lt.s32.totalorder %s1494_s10, %s1494_s10 }
  0x31   : > { %p1497_p11 = pnand %p1495_p10, %p1455_p7  ;;  %p1504_p1 = por %p1503_p0, %p1502_p13 }
  0x33   : > { %p1498_p12 = pneg %p1497_p11 }
  0x35   : > { %p1505_p4 = pnand %p1504_p1, %p1498_p12 }
  0x37   : > { %1508 = shalt.err (!%p1505_p4)
}
  0x38   : > { %1314 = dma.hbm_to_vmem [thread:$0]  (!%p1600_p5), %s1748_s4, 4096, %s1604_s13, [#allocation6], %s1527_s23, %s1527_s23, %s1528_s24  }
  0x39   : > { %p1759_p6 = scmp.ne.s32.totalorder %s1756_s7, 0 }
  0x3a   : > { %p1760_p2 = scmp.ne.s32.totalorder (!%p1759_p6), %s1757_s11, 0 }
  0x3b   : > { %304 = sbr.rel (%p1759_p6) target bundleno = 826 (0x33a), region = 52 }
  0x42   : > { %1514 = dma.done.wait (%p1760_p2), [#allocation4], 4096  }
  0x43   : > { %1516 = vsyncadd (%p1760_p2), [#allocation4], 4294963200 }
  0x44   : > { %1518 = dma.done.wait (%p1760_p2), [#allocation6], 4096  }
  0x45   : > { %1520 = vsyncadd (%p1760_p2), [#allocation6], 4294963200  ;;  %v1333_v1 = vld [vmem:[#allocation3 + $0x4] ss:$8 sps:$4 sm:$0xff]   ;;  %v1335_v2 = vld [vmem:[#allocation3] ss:$8 sps:$4 sm:$0xff]  }
  0x46   : > { %590 = vmatprep.subr.bf16.mxu0 %v1333_v1  ;;  %v1336_v3 = vld [vmem:[#allocation3 + $0x14] ss:$8 sps:$4 sm:$0xff]   ;;  %v1338_v4 = vld [vmem:[#allocation3 + $0x10] ss:$8 sps:$4 sm:$0xff]   ;;  %v1339_v5 = vld [vmem:[#allocation3 + $0x24] ss:$8 sps:$4 sm:$0xff]  }
  0x47   : > { %591 = vmatpush1.bf16.msra.mxu0 %v1335_v2  ;;  %s1183_s7 = sshll.u32 %s1174_s30, 1  ;;  %v1341_v6 = vld [vmem:[#allocation3 + $0x20] ss:$8 sps:$4 sm:$0xff]   ;;  %v1342_v7 = vld [vmem:[#allocation3 + $0x34] ss:$8 sps:$4 sm:$0xff]   ;;  %vm1081_vm0 = vcmask 64512  }
  0x48   : > { %592 = vmatprep.subr.bf16.mxu0 %v1336_v3  ;;  %p350_p5 = scmp.lt.s32.totalorder %s1183_s7, 3  ;;  %v1344_v8 = vld [vmem:[#allocation3 + $0x30] ss:$8 sps:$4 sm:$0xff]   ;;  %v1345_v9 = vld [vmem:[#allocation3 + $0x44] ss:$8 sps:$4 sm:$0xff]  }
  0x49   : > { %v1347_v10 = vld [vmem:[#allocation3 + $0x40] ss:$8 sps:$4 sm:$0xff]   ;;  %v1348_v11 = vld [vmem:[#allocation3 + $0x54] ss:$8 sps:$4 sm:$0xff]   ;;  %v1350_v12 = vld [vmem:[#allocation3 + $0x50] ss:$8 sps:$4 sm:$0xff]  }
  0x4a   : > { %s1762_s7 = smov (!%p350_p5, %s1183_s7), 3  ;;  %v1351_v13 = vld [vmem:[#allocation3 + $0x64] ss:$8 sps:$4 sm:$0xff]   ;;  %v1353_v14 = vld [vmem:[#allocation3 + $0x60] ss:$8 sps:$4 sm:$0xff]  }
  0x4b   : > { %593 = vmatpush1.bf16.msra.mxu0 %v1338_v4  ;;  %s1665_s11 = sshll.u32 %s1762_s7, 3  ;;  %v1354_v17 = vld [vmem:[#allocation3 + $0x74] ss:$8 sps:$4 sm:$0xff]   ;;  %v1381_v22 = vld [vmem:[#allocation5 + $0x4] ss:$8 sps:$4 sm:$0xff]  }
  0x4c   : > { %594 = vmatprep.subr.bf16.mxu0 %v1339_v5  ;;  %s354_s14 = scalar_lea.vmem %s1744_s0, %s1665_s11  ;;  %s361_s22 = scalar_lea.vmem %s1745_s1, %s1665_s11  ;;  %v1383_v23 = vld [vmem:[#allocation5] ss:$8 sps:$4 sm:$0xff]   ;;  %v1384_v24 = vld [vmem:[#allocation5 + $0x14] ss:$8 sps:$4 sm:$0xff]   ;;  %843 = vmatprep.subr.bf16.mxu1 %v1381_v22  ;;  %v1386_v26 = vld [vmem:[#allocation5 + $0x10] ss:$8 sps:$4 sm:$0xff]  }
  0x4d   : > { %v370_v15 = vld [vmem:[%s354_s14] sm:$0xff]  ;;  %v371_v16 = vld [vmem:[%s354_s14 + $0x8] sm:$0xff]  ;;  %844 = vmatpush1.bf16.msra.mxu1 %v1383_v23  ;;  %v1356_v27 = vld [vmem:[#allocation3 + $0x70] ss:$8 sps:$4 sm:$0xff]   ;;  %s367_s14 = scalar_lea.vmem %s1752_s8, %s1665_s11 }
  0x4e   : > { %v372_v18 = vld [vmem:[%s361_s22] sm:$0xff]  ;;  %v373_v19 = vld [vmem:[%s361_s22 + $0x8] sm:$0xff]  ;;  %845 = vmatprep.subr.bf16.mxu1 %v1384_v24  ;;  %v1392_v34 = vld [vmem:[#allocation5 + $0x30] ss:$8 sps:$4 sm:$0xff]  }
  0x4f   : > { %595 = vmatpush1.bf16.msra.mxu0 %v1341_v6  ;;  %v1675_v20 = vmul.bf16 %v372_v18, %v370_v15  ;;  %v1677_v21 = vmul.bf16 %v373_v19, %v371_v16  ;;  %v1387_v28 = vld [vmem:[#allocation5 + $0x24] ss:$8 sps:$4 sm:$0xff]   ;;  %v1389_v30 = vld [vmem:[#allocation5 + $0x20] ss:$8 sps:$4 sm:$0xff]   ;;  %v1390_v32 = vld [vmem:[#allocation5 + $0x34] ss:$8 sps:$4 sm:$0xff]  }
  0x50   : > { %596 = vmatprep.subr.bf16.mxu0 %v1342_v7  ;;  %v1357_v29 = vld [vmem:[#allocation3 + $0x84] ss:$8 sps:$4 sm:$0xff]   ;;  %v1359_v31 = vld [vmem:[#allocation3 + $0x80] ss:$8 sps:$4 sm:$0xff]   ;;  %v1360_v33 = vld [vmem:[#allocation3 + $0x94] ss:$8 sps:$4 sm:$0xff]  }
  0x51   : > { %v1192_v25 = vcombine.high %v1675_v20, %v1677_v21  ;;  %846 = vmatpush1.bf16.msra.mxu1 %v1386_v26  ;;  %v1362_v35 = vld [vmem:[#allocation3 + $0x90] ss:$8 sps:$4 sm:$0xff]   ;;  %v1393_v36 = vld [vmem:[#allocation5 + $0x44] ss:$8 sps:$4 sm:$0xff]   ;;  %v1365_v38 = vld [vmem:[#allocation3 + $0xa0] ss:$8 sps:$4 sm:$0xff]   ;;  %v1191_v61 = vcombine.low %v1675_v20, %v1677_v21  ;;  %v410_v20 = vlaneseq }
  0x52   : > { %847 = vmatprep.subr.bf16.mxu1 %v1387_v28  ;;  %v1363_v37 = vld [vmem:[#allocation3 + $0xa4] ss:$8 sps:$4 sm:$0xff]   ;;  %v1395_v39 = vld [vmem:[#allocation5 + $0x40] ss:$8 sps:$4 sm:$0xff]   ;;  %v1366_v40 = vld [vmem:[#allocation3 + $0xb4] ss:$8 sps:$4 sm:$0xff]  }
  0x53   : > { %597 = vmatpush1.bf16.msra.mxu0 %v1344_v8  ;;  %622 = vmatprep.mubr.bf16.mxu0 %v1192_v25  ;;  %v1396_v41 = vld [vmem:[#allocation5 + $0x54] ss:$8 sps:$4 sm:$0xff]   ;;  %v1398_v42 = vld [vmem:[#allocation5 + $0x50] ss:$8 sps:$4 sm:$0xff]   ;;  %v1399_v44 = vld [vmem:[#allocation5 + $0x64] ss:$8 sps:$4 sm:$0xff]  }
  0x54   : > { %598 = vmatprep.subr.bf16.mxu0 %v1345_v9  ;;  %v1368_v43 = vld [vmem:[#allocation3 + $0xb0] ss:$8 sps:$4 sm:$0xff]   ;;  %v1369_v45 = vld [vmem:[#allocation3 + $0xc4] ss:$8 sps:$4 sm:$0xff]   ;;  %v1401_v46 = vld [vmem:[#allocation5 + $0x60] ss:$8 sps:$4 sm:$0xff]  }
  0x55   : > { %848 = vmatpush1.bf16.msra.mxu1 %v1389_v30  ;;  %v1371_v47 = vld [vmem:[#allocation3 + $0xc0] ss:$8 sps:$4 sm:$0xff]   ;;  %v1402_v48 = vld [vmem:[#allocation5 + $0x74] ss:$8 sps:$4 sm:$0xff]   ;;  %v1404_v50 = vld [vmem:[#allocation5 + $0x70] ss:$8 sps:$4 sm:$0xff]  }
  0x56   : > { %849 = vmatprep.subr.bf16.mxu1 %v1390_v32  ;;  %v1372_v49 = vld [vmem:[#allocation3 + $0xd4] ss:$8 sps:$4 sm:$0xff]   ;;  %v1374_v51 = vld [vmem:[#allocation3 + $0xd0] ss:$8 sps:$4 sm:$0xff]   ;;  %v1405_v52 = vld [vmem:[#allocation5 + $0x84] ss:$8 sps:$4 sm:$0xff]  }
  0x57   : > { %599 = vmatpush1.bf16.msra.mxu0 %v1347_v10  ;;  %v1375_v53 = vld [vmem:[#allocation3 + $0xe4] ss:$8 sps:$4 sm:$0xff]   ;;  %v1407_v54 = vld [vmem:[#allocation5 + $0x80] ss:$8 sps:$4 sm:$0xff]   ;;  %v1408_v56 = vld [vmem:[#allocation5 + $0x94] ss:$8 sps:$4 sm:$0xff]  }
  0x58   : > { %600 = vmatprep.subr.bf16.mxu0 %v1348_v11  ;;  %v1377_v55 = vld [vmem:[#allocation3 + $0xe0] ss:$8 sps:$4 sm:$0xff]   ;;  %v1378_v57 = vld [vmem:[#allocation3 + $0xf4] ss:$8 sps:$4 sm:$0xff]   ;;  %v1410_v58 = vld [vmem:[#allocation5 + $0x90] ss:$8 sps:$4 sm:$0xff]  }
  0x59   : > { %850 = vmatpush1.bf16.msra.mxu1 %v1392_v34  ;;  %v1380_v59 = vld [vmem:[#allocation3 + $0xf0] ss:$8 sps:$4 sm:$0xff]   ;;  %v1411_v60 = vld [vmem:[#allocation5 + $0xa4] ss:$8 sps:$4 sm:$0xff]   ;;  %v1413_v62 = vld [vmem:[#allocation5 + $0xa0] ss:$8 sps:$4 sm:$0xff]  }
  0x5a   : > { %851 = vmatprep.subr.bf16.mxu1 %v1393_v36  ;;  %v1414_v63 = vld [vmem:[#allocation5 + $0xb4] ss:$8 sps:$4 sm:$0xff]   ;;  %v1416_v0 = vld [vmem:[#allocation5 + $0xb0] ss:$8 sps:$4 sm:$0xff]   ;;  %v1417_v1 = vld [vmem:[#allocation5 + $0xc4] ss:$8 sps:$4 sm:$0xff]  }
  0x5b   : > { %601 = vmatpush1.bf16.msra.mxu0 %v1350_v12  ;;  %v1419_v2 = vld [vmem:[#allocation5 + $0xc0] ss:$8 sps:$4 sm:$0xff]   ;;  %v1420_v3 = vld [vmem:[#allocation5 + $0xd4] ss:$8 sps:$4 sm:$0xff]   ;;  %v1422_v4 = vld [vmem:[#allocation5 + $0xd0] ss:$8 sps:$4 sm:$0xff]  }
  0x5c   : > { %602 = vmatprep.subr.bf16.mxu0 %v1351_v13  ;;  %v1423_v5 = vld [vmem:[#allocation5 + $0xe4] ss:$8 sps:$4 sm:$0xff]   ;;  %v1425_v6 = vld [vmem:[#allocation5 + $0xe0] ss:$8 sps:$4 sm:$0xff]   ;;  %v1426_v7 = vld [vmem:[#allocation5 + $0xf4] ss:$8 sps:$4 sm:$0xff]  }
  0x5d   : > { %852 = vmatpush1.bf16.msra.mxu1 %v1395_v39  ;;  %v1428_v8 = vld [vmem:[#allocation5 + $0xf0] ss:$8 sps:$4 sm:$0xff]   ;;  %v1429_v9 = vld [vmem:[%s1750_s6 + $0x40] sm:$0xff]   ;;  %v1431_v11 = vld [vmem:[%s1750_s6 + $0x48] sm:$0xff]   ;;  %v411_v21 = vshrl.u32 %v410_v20, 7 }
  0x5e   : > { %853 = vmatprep.subr.bf16.mxu1 %v1396_v41  ;;  %v1430_v10 = vld [vmem:[%s1750_s6] sm:$0xff]   ;;  %v1432_v12 = vld [vmem:[%s1750_s6 + $0x8] sm:$0xff]   ;;  %v1433_v13 = vld [vmem:[%s1750_s6 + $0x50] sm:$0xff]  }
  0x5f   : > { %603 = vmatpush1.bf16.msra.mxu0 %v1353_v14  ;;  %v1434_v14 = vld [vmem:[%s1750_s6 + $0x10] sm:$0xff]   ;;  %v1435_v15 = vld [vmem:[%s1750_s6 + $0x58] sm:$0xff]   ;;  %v1438_v18 = vld [vmem:[%s1750_s6 + $0x20] sm:$0xff]   ;;  %v412_v22 = vsub.s32 0, %v411_v21  ;;  %v416_v24 = vsub.s32 1, %v411_v21 }
  0x60   : > { %604 = vmatprep.subr.bf16.mxu0 %v1354_v17  ;;  %v1436_v16 = vld [vmem:[%s1750_s6 + $0x18] sm:$0xff]   ;;  %v1437_v17 = vld [vmem:[%s1750_s6 + $0x60] sm:$0xff]   ;;  %v1439_v19 = vld [vmem:[%s1750_s6 + $0x68] sm:$0xff]  }
  0x61   : > { %854 = vmatpush1.bf16.msra.mxu1 %v1398_v42  ;;  %v408_v23 = vld [vmem:[%s1747_s3] sm:$0x3]  ;;  %v1440_v41 = vld [vmem:[%s1750_s6 + $0x28] sm:$0xff]   ;;  %v1441_v42 = vld [vmem:[%s1750_s6 + $0x70] sm:$0xff]  }
  0x62   : > { %855 = vmatprep.subr.bf16.mxu1 %v1399_v44  ;;  %v413_v25 = vrot.slane %v408_v23, %v412_v22  ;;  %v417_v26 = vrot.slane %v408_v23, %v416_v24  ;;  %v1443_v44 = vld [vmem:[%s1750_s6 + $0x78] sm:$0xff]  }
  0x63   : > { %605 = vmatpush1.bf16.msra.mxu0 %v1356_v27 }
  0x64   : > { %606 = vmatprep.subr.bf16.mxu0 %v1357_v29 }
  0x65   : > { %856 = vmatpush1.bf16.msra.mxu1 %v1401_v46  ;;  %v1257_v46 = vld [vmem:[#allocation2] ss:$0 sm:$0xff] }
  0x66   : > { %857 = vmatprep.subr.bf16.mxu1 %v1402_v48  ;;  %v671_v48 = vld [vmem:[%s1749_s5] sm:$0x3] }
  0x67   : > { %607 = vmatpush1.bf16.msra.mxu0 %v1359_v31 }
  0x68   : > { %608 = vmatprep.subr.bf16.mxu0 %v1360_v33 }
  0x69   : > { %858 = vmatpush1.bf16.msra.mxu1 %v1404_v50  ;;  %v680_v50 = vrot.slane %v671_v48, %v416_v24 }
  0x6a   : > { %859 = vmatprep.subr.bf16.mxu1 %v1405_v52 }
  0x6b   : > { %609 = vmatpush1.bf16.msra.mxu0 %v1362_v35 }
  0x6c   : > { %610 = vmatprep.subr.bf16.mxu0 %v1363_v37 }
  0x6d   : > { %860 = vmatpush1.bf16.msra.mxu1 %v1407_v54 }
  0x6e   : > { %861 = vmatprep.subr.bf16.mxu1 %v1408_v56 }
  0x6f   : > { %611 = vmatpush1.bf16.msra.mxu0 %v1365_v38 }
  0x70   : > { %612 = vmatprep.subr.bf16.mxu0 %v1366_v40 }
  0x71   : > { %862 = vmatpush1.bf16.msra.mxu1 %v1410_v58 }
  0x72   : > { %863 = vmatprep.subr.bf16.mxu1 %v1411_v60 }
  0x73   : > { %613 = vmatpush1.bf16.msra.mxu0 %v1368_v43  ;;  %v1442_v43 = vld [vmem:[%s1750_s6 + $0x30] sm:$0xff]  }
  0x74   : > { %614 = vmatprep.subr.bf16.mxu0 %v1369_v45  ;;  %v1444_v45 = vld [vmem:[%s1750_s6 + $0x38] sm:$0xff]  }
  0x75   : > { %864 = vmatpush1.bf16.msra.mxu1 %v1413_v62 }
  0x76   : > { %865 = vmatprep.subr.bf16.mxu1 %v1414_v63 }
  0x77   : > { %615 = vmatpush1.bf16.msra.mxu0 %v1371_v47  ;;  %v1529_v47 = vmov 0  }
  0x78   : > { %616 = vmatprep.subr.bf16.mxu0 %v1372_v49  ;;  %1332 = vset.pattern.permute.xlu0 %v1529_v47  ;;  %v676_v49 = vrot.slane %v671_v48, %v412_v22 }
  0x79   : > { %866 = vmatpush1.bf16.msra.mxu1 %v1416_v0  ;;  %931 = vperm.xlu0 %1332, %v1257_v46  }
  0x7a   : > { %867 = vmatprep.subr.bf16.mxu1 %v1417_v1 }
  0x7b   : > { %617 = vmatpush1.bf16.msra.mxu0 %v1374_v51 }
  0x7c   : > { %618 = vmatprep.subr.bf16.mxu0 %v1375_v53 }
  0x7d   : > { %868 = vmatpush1.bf16.msra.mxu1 %v1419_v2 }
  0x7e   : > { %869 = vmatprep.subr.bf16.mxu1 %v1420_v3 }
  0x7f   : > { %619 = vmatpush1.bf16.msra.mxu0 %v1377_v55 }
  0x80   : > { %620 = vmatprep.subr.bf16.mxu0 %v1378_v57 }
  0x81   : > { %870 = vmatpush1.bf16.msra.mxu1 %v1422_v4 }
  0x82   : > { %871 = vmatprep.subr.bf16.mxu1 %v1423_v5 }
  0x83   : > { %621 = vmatpush1.bf16.msra.mxu0 %v1380_v59 }
  0x84   : > { %1278 = vmatprep.subr.bf16.mxu0 %v1429_v9 }
  0x85   : > { %872 = vmatpush1.bf16.msra.mxu1 %v1425_v6 }
  0x86   : > { %623 = vmatmul.mubr.bf16.vlgmr.msra.gmra.mrb[0].mxu0 %v1191_v61  ;;  %873 = vmatprep.subr.bf16.mxu1 %v1426_v7 }
  0x87   : > { %1279 = vmatpush3.bf16.msra.mxu0 %v1430_v10 }
  0x88   : > { %1280 = vmatprep.subr.bf16.mxu0 %v1431_v11 }
  0x89   : > { %874 = vmatpush1.bf16.msra.mxu1 %v1428_v8 }
  0x8b   : > { %1281 = vmatpush3.bf16.msra.mxu0 %v1432_v12 }
  0x8c   : > { %1282 = vmatprep.subr.bf16.mxu0 %v1433_v13 }
  0x8f   : > { %1283 = vmatpush3.bf16.msra.mxu0 %v1434_v14 }
  0x90   : > { %1284 = vmatprep.subr.bf16.mxu0 %v1435_v15 }
  0x93   : > { %1285 = vmatpush3.bf16.msra.mxu0 %v1436_v16 }
  0x94   : > { %1286 = vmatprep.subr.bf16.mxu0 %v1437_v17 }
  0x97   : > { %1287 = vmatpush3.bf16.msra.mxu0 %v1438_v18 }
  0x98   : > { %1288 = vmatprep.subr.bf16.mxu0 %v1439_v19 }
  0x9b   : > { %1289 = vmatpush3.bf16.msra.mxu0 %v1440_v41 }
  0x9c   : > { %1290 = vmatprep.subr.bf16.mxu0 %v1441_v42 }
  0x9f   : > { %1291 = vmatpush3.bf16.msra.mxu0 %v1442_v43 }
  0xa0   : > { %1292 = vmatprep.subr.bf16.mxu0 %v1443_v44 }
  0xa3   : > { %1293 = vmatpush3.bf16.msra.mxu0 %v1444_v45 }
  0xf8   : > { %v932_v3 = vpop.permute.xlu0 %931 }
 0x159   : > { %v624_v27 = vpop.f32.mrb[0].mxu0 }
 0x15a   : > { %v625_v28 = vadd.f32 %v624_v27, %v413_v25  ;;  %v626_v29 = vpop.f32.mrb[1].mxu0 }
 0x15b   : > { %v627_v30 = vadd.f32 %v626_v29, %v417_v26  ;;  %v628_v31 = vpop.f32.mrb[2].mxu0 }
 0x15c   : > { %v629_v32 = vadd.f32 %v628_v31, %v413_v25  ;;  %v630_v33 = vpop.f32.mrb[3].mxu0  ;;  %v633_v35 = vmax.f32 %v625_v28, 0.0 }
 0x15d   : > { %v631_v34 = vadd.f32 %v630_v33, %v417_v26  ;;  %v634_v37 = vmax.f32 %v627_v30, 0.0 }
 0x15e   : > { %v635_v36 = vmax.f32 %v629_v32, 0.0 }
 0x15f   : > { %v636_v38 = vmax.f32 %v631_v34, 0.0 }
 0x160   : > { %v637_v39 = vpack.c.bf16 %v635_v36, %v633_v35 }
 0x161   : > { %v638_v40 = vpack.c.bf16 %v636_v38, %v634_v37 }
 0x163   : > { %875 = vmatprep.mubr.bf16.mxu1 %v638_v40 }
 0x164   : > { %876 = vmatmul.mubr.bf16.vlgmr.msra.gmra.mrb[0].mxu1 %v637_v39 }
 0x237   : > { %v877_v51 = vpop.f32.mrb[0].mxu1 }
 0x238   : > { %v878_v52 = vadd.f32 %v877_v51, %v676_v49  ;;  %v879_v53 = vpop.f32.mrb[1].mxu1 }
 0x239   : > { %v880_v54 = vadd.f32 %v879_v53, %v680_v50  ;;  %v881_v55 = vpop.f32.mrb[2].mxu1 }
 0x23a   : > { %v882_v56 = vadd.f32 %v881_v55, %v676_v49  ;;  %v883_v57 = vpop.f32.mrb[3].mxu1  ;;  %v886_v59 = vmax.f32 %v878_v52, 0.0 }
 0x23b   : > { %v884_v58 = vadd.f32 %v883_v57, %v680_v50  ;;  %v887_v61 = vmax.f32 %v880_v54, 0.0 }
 0x23c   : > { %v888_v60 = vmax.f32 %v882_v56, 0.0 }
 0x23d   : > { %v889_v62 = vmax.f32 %v884_v58, 0.0 }
 0x23e   : > { %v890_v63 = vpack.c.bf16 %v888_v60, %v886_v59 }
 0x23f   : > { %v891_v0 = vpack.c.bf16 %v889_v62, %v887_v61 }
 0x241   : > { %1062 = vmatprep.mubr.bf16.mxu0 %v891_v0 }
 0x242   : > { %1063 = vmatmul.mubr.bf16.vlgmr.msra.gmra.mrb[4].mxu0 %v890_v63 }
 0x315   : > { %v1294_v1 = vpop.f32.mrb[4].mxu0 }
 0x316   : > { %v1295_v2 = vpop.f32.mrb[5].mxu0 }
 0x317   : > { %v1296_v4 = vadd.f32 %v1295_v2, %v1294_v1  ;;  %v1297_v5 = vpop.f32.mrb[6].mxu0 }
 0x318   : > { %v1298_v6 = vpop.f32.mrb[7].mxu0 }
 0x319   : > { %v1065_v7 = vadd.f32 %v1296_v4, %v932_v3  ;;  %v1299_v8 = vadd.f32 %v1298_v6, %v1297_v5 }
 0x31b   : > { %v1071_v9 = vsub.f32 0.0, %v1065_v7  ;;  %v1068_v10 = vadd.f32 %v1299_v8, %v932_v3 }
 0x31d   : > { %v1073_v11 = vmul.f32 1.442695, %v1071_v9  ;;  %v1072_v12 = vsub.f32 0.0, %v1068_v10 }
 0x31f   : > { %1445 = vpow2.f32 %v1073_v11  ;;  %v1075_v13 = vmul.f32 1.442695, %v1072_v12 }
 0x321   : > { %1447 = vpow2.f32 %v1075_v13 }
 0x329   : > { %v1446_v14 = vpop.eup %1445 }
 0x32a   : > { %v1077_v15 = vadd.f32 1.0, %v1446_v14 }
 0x32b   : > { %v1448_v16 = vpop.eup %1447 }
 0x32c   : > { %1449 = vrcp.f32 %v1077_v15  ;;  %v1078_v17 = vadd.f32 1.0, %v1448_v16 }
 0x32e   : > { %1451 = vrcp.f32 %v1078_v17 }
 0x336   : > { %v1450_v18 = vpop.eup %1449 }
 0x337   : > { %1082 = vst.msk [vmem:[%s367_s14] sm:$0xff] %vm1081_vm0, %v1450_v18 }
 0x338   : > { %v1452_v19 = vpop.eup %1451 }
 0x339   : > { %1083 = vst.msk [vmem:[%s367_s14 + $0x8] sm:$0xff] %vm1081_vm0, %v1452_v19 }
 0x33a PF: > { %s22_s29 = sadd.s32 1, %s1523_s29  }
 0x33b   : > { %p19_p7 = scmp.ge.s32.totalorder %s22_s29, 4  }
 0x33d   :  { %21 = sbr.rel (!%p19_p7) target bundleno = 5 (0x5), region = 94 }
 0x344   :  { %1106 = vsyncpa [#allocation4], 1 }
 0x345   :  { %1108 = vsyncpa [#allocation4 + $0x1], 1 }
 0x346   :  { %1109 = vsyncpa [#allocation6], 1 }

</bundles_post_ra>
